<compile_context>
chip_gen: v6e
topology: v6e:2x2x1
jax: 0.10.0
libtpu: 0.0.40
codegen_flags: <defaults>
</compile_context>

<pallas_src>
import jax
import jax.numpy as jnp
from jax.experimental import pallas as pl
from jax.experimental.pallas import tpu as pltpu


# ---------------------------------------------------------------------------
# Helpers
# ---------------------------------------------------------------------------

def _round_up(x, m):
    return ((x + m - 1) // m) * m


_EPS_SQ = 1e-24  # matches F.normalize(eps=1e-12): x * rsqrt(max(sum(x^2), eps^2))


# ---------------------------------------------------------------------------
# Kernels
# ---------------------------------------------------------------------------

def _linear_kernel(x_ref, w_ref, b_ref, o_ref):
    """Single K step: out = x @ W + b (f32 accumulate / f32 epilogue)."""
    o_ref[...] = (jnp.dot(x_ref[...], w_ref[...],
                          preferred_element_type=jnp.float32)
                  + b_ref[...]).astype(o_ref.dtype)


def _linear_norm_kernel(x_ref, w_ref, b_ref, o_ref):
    """Single K step: out = L2-normalize(x @ W + b) along dim=1."""
    feat = jnp.dot(x_ref[...], w_ref[...],
                   preferred_element_type=jnp.float32) + b_ref[...]
    sumsq = jnp.sum(feat * feat, axis=1, keepdims=True)
    inv = jax.lax.rsqrt(jnp.maximum(sumsq, _EPS_SQ))
    o_ref[...] = (feat * inv).astype(o_ref.dtype)


def _make_k_tiled_kernel(tk, resident_w, normalize):
    """K-tiled matmul accumulating straight into the (f32) output block.

    Grid = (batch_tiles, k_tiles); K is the last ("arbitrary") axis and the
    output block index is constant over it, so o_ref is resident and acts as
    the accumulator (no VMEM scratch).
    """

    def kernel(x_ref, w_ref, b_ref, o_ref):
        k = pl.program_id(1)

        if resident_w:
            # Whole weight resident in VMEM; slice the current K slab.
            off = pl.multiple_of(k * tk, 128)
            w = w_ref[pl.ds(off, tk), :]
        else:
            w = w_ref[...]

        part = jnp.dot(x_ref[...], w, preferred_element_type=jnp.float32)

        @pl.when(k == 0)
        def _():
            o_ref[...] = part

        @pl.when(k > 0)
        def _():
            o_ref[...] += part

        @pl.when(k == pl.num_programs(1) - 1)
        def _():
            feat = o_ref[...] + b_ref[...]  # bias added once, at finalize
            if normalize:
                sumsq = jnp.sum(feat * feat, axis=1, keepdims=True)
                feat = feat * jax.lax.rsqrt(jnp.maximum(sumsq, _EPS_SQ))
            o_ref[...] = feat

    return kernel


# ---------------------------------------------------------------------------
# Parameter preparation (one-time: head folding, lane padding, dtype cast)
# ---------------------------------------------------------------------------

def prepare_params(params, compute_dtype=jnp.bfloat16):
    w_body = jnp.asarray(params["w_body"], jnp.float32)
    b_body = jnp.asarray(params["b_body"], jnp.float32)
    Din, Dh = w_body.shape
    De = params["w_e"].shape[1]
    Dp = params["w_p"].shape[1]
    Dd = params["w_d"].shape[1]
    N = De + Dp + Dd

    Dh_pad = _round_up(Dh, 128)
    N_pad = _round_up(N, 128)

    # --- skip_head path: body weight, lane-padded to Dh_pad ---
    wb = (jnp.zeros((Din, Dh_pad), compute_dtype)
          .at[:, :Dh].set(w_body.astype(compute_dtype)))
    bb = jnp.zeros((1, Dh_pad), jnp.float32).at[0, :Dh].set(b_body)

    # --- heads path: fold the 3 heads into the (linear) body algebraically ---
    # TODO(synk): valid only while `body` is the linear stand-in; with a real
    # ViT backbone keep the two-stage body -> heads structure.
    wh_cat = jnp.concatenate([params["w_e"], params["w_p"], params["w_d"]],
                             axis=1).astype(jnp.float32)
    bh_cat = jnp.concatenate([params["b_e"], params["b_p"], params["b_d"]],
                             axis=0).astype(jnp.float32)
    w_fused = w_body @ wh_cat                 # (Din, N)
    b_fused = b_body @ wh_cat + bh_cat        # (N,)
    wf = (jnp.zeros((Din, N_pad), compute_dtype)
          .at[:, :N].set(w_fused.astype(compute_dtype)))
    bf = jnp.zeros((1, N_pad), jnp.float32).at[0, :N].set(b_fused)

    dims = dict(Din=Din, Dh=Dh, Dh_pad=Dh_pad,
                De=De, Dp=Dp, Dd=Dd, N=N, N_pad=N_pad)
    return dict(wb=wb, bb=bb, wf=wf, bf=bf, dims=dims,
                compute_dtype=jnp.dtype(compute_dtype))


# ---------------------------------------------------------------------------
# HeadSwitch forward (one pallas_call per forward)
# ---------------------------------------------------------------------------

def head_switch_forward(x_nchw, prepared, skip_head=False, *,
                        tk_max=1024, tm_max=256):
    """x_nchw: (B, C, H, W). Returns (x_e, x_p, x_d) or L2-normalized features."""
    d = prepared["dims"]
    cdtype = prepared["compute_dtype"]

    B = x_nchw.shape[0]
    x_flat = x_nchw.reshape(B, -1)            # glue: NCHW flatten for linear body
    Din = x_flat.shape[1]
    assert Din == d["Din"], "input feature dim mismatch with body weight"

    if skip_head:
        w, b, Nout_pad, Nout = prepared["wb"], prepared["bb"], d["Dh_pad"], d["Dh"]
    else:
        w, b, Nout_pad, Nout = prepared["wf"], prepared["bf"], d["N_pad"], d["N"]

    # --- Tiling ---------------------------------------------------------
    B_pad8 = _round_up(B, 8)
    tm = min(tm_max, B_pad8)
    # v7x megacore: give the "parallel" batch axis >=2 blocks once the batch
    # is big enough to split (2 TensorCores per chip).
    if tm == B_pad8 and B_pad8 >= 32:
        tm = _round_up(B_pad8 // 2, 8)
    B_pad = _round_up(B_pad8, tm)
    batch_tiles = B_pad // tm

    tk = _round_up(min(tk_max, Din), 128)
    Din_pad = _round_up(Din, tk)
    k_tiles = Din_pad // tk

    # --- Inputs: cast to compute dtype; pad ONLY when actually required ---
    x_in = x_flat if x_flat.dtype == cdtype else x_flat.astype(cdtype)
    if B_pad != B or Din_pad != Din:
        x_in = jnp.zeros((B_pad, Din_pad), cdtype).at[:B, :Din].set(x_in)
    if Din_pad != Din:
        w = jnp.zeros((Din_pad, Nout_pad), w.dtype).at[:Din, :].set(w)

    cparams = pltpu.CompilerParams(
        dimension_semantics=("parallel",) if k_tiles == 1
        else ("parallel", "arbitrary"),
        vmem_limit_bytes=32 * 1024 * 1024)

    # f32 output: accumulation target for the K-tiled path, f32 epilogue math.
    out_shape = jax.ShapeDtypeStruct((B_pad, Nout_pad), jnp.float32)

    if k_tiles == 1:
        # Single K step per batch tile: branch-free, scratch-free kernel.
        kern = _linear_norm_kernel if skip_head else _linear_kernel
        out = pl.pallas_call(
            kern,
            grid=(batch_tiles,),
            out_shape=out_shape,
            in_specs=[
                pl.BlockSpec((tm, Din_pad), lambda i: (i, 0)),       # x tile
                pl.BlockSpec((Din_pad, Nout_pad), lambda i: (0, 0)), # weight (resident)
                pl.BlockSpec((1, Nout_pad), lambda i: (0, 0)),       # bias (f32)
            ],
            out_specs=pl.BlockSpec((tm, Nout_pad), lambda i: (i, 0)),
            compiler_params=cparams,
        )(x_in, w, b)
    else:
        # K-tiled accumulate into the resident f32 output block.
        w_bytes = Din_pad * Nout_pad * jnp.dtype(w.dtype).itemsize
        # Keep the full weight VMEM-resident when it fits: it is then DMA'd
        # once instead of once per batch tile.
        resident_w = (batch_tiles > 1) and (2 * w_bytes <= 16 * 1024 * 1024)
        kern = _make_k_tiled_kernel(tk, resident_w, normalize=skip_head)
        if resident_w:
            w_spec = pl.BlockSpec((Din_pad, Nout_pad), lambda i, k: (0, 0))
        else:
            w_spec = pl.BlockSpec((tk, Nout_pad), lambda i, k: (k, 0))
        out = pl.pallas_call(
            kern,
            grid=(batch_tiles, k_tiles),
            out_shape=out_shape,
            in_specs=[
                pl.BlockSpec((tm, tk), lambda i, k: (i, k)),         # x tile
                w_spec,                                              # weight
                pl.BlockSpec((1, Nout_pad), lambda i, k: (0, 0)),    # bias (f32)
            ],
            out_specs=pl.BlockSpec((tm, Nout_pad), lambda i, k: (i, 0)),
            compiler_params=cparams,
        )(x_in, w, b)

    if skip_head:
        return out[:B, :Nout]
    De, Dp, Dd = d["De"], d["Dp"], d["Dd"]
    return (out[:B, :De],
            out[:B, De:De + Dp],
            out[:B, De + Dp:De + Dp + Dd])


# ---------------------------------------------------------------------------
# Reference (plain JAX, follows the PyTorch two-stage structure)
# ---------------------------------------------------------------------------

def _reference(x, params):
    feat = x.reshape(x.shape[0], -1) @ params["w_body"] + params["b_body"]
    ref_e = feat @ params["w_e"] + params["b_e"]
    ref_p = feat @ params["w_p"] + params["b_p"]
    ref_d = feat @ params["w_d"] + params["b_d"]
    ref_n = feat / jnp.maximum(
        jnp.linalg.norm(feat, axis=1, keepdims=True), 1e-12)
    return ref_e, ref_p, ref_d, ref_n


def _make_params(key, Din, Dh, De, Dp, Dd):
    ks = jax.random.split(key, 8)
    return {
        "w_body": jax.random.normal(ks[0], (Din, Dh), jnp.float32) * 0.02,
        "b_body": jax.random.normal(ks[1], (Dh,), jnp.float32) * 0.02,
        "w_e": jax.random.normal(ks[2], (Dh, De), jnp.float32) * 0.02,
        "b_e": jax.random.normal(ks[3], (De,), jnp.float32) * 0.02,
        "w_p": jax.random.normal(ks[4], (Dh, Dp), jnp.float32) * 0.02,
        "b_p": jax.random.normal(ks[5], (Dp,), jnp.float32) * 0.02,
        "w_d": jax.random.normal(ks[6], (Dh, Dd), jnp.float32) * 0.02,
        "b_d": jax.random.normal(ks[7], (Dd,), jnp.float32) * 0.02,
    }


def _check(name, got, ref, atol, rtol):
    assert got.shape == ref.shape, (name, got.shape, ref.shape)
    assert jnp.allclose(got, ref, atol=atol, rtol=rtol), (
        f"{name}: max abs err = {float(jnp.max(jnp.abs(got - ref)))}")


# ---------------------------------------------------------------------------
# Main
# ---------------------------------------------------------------------------

if __name__ == "__main__":
    key = jax.random.PRNGKey(0)
    k_x1, k_p1, k_x2, k_p2 = jax.random.split(key, 4)

    # ----- Test 1: spec-scale shapes; single grid-step fast path -----------
    B, C, H, W = 2, 4, 16, 16
    Din, Dh, De, Dp, Dd = C * H * W, 32, 16, 16, 16
    x = jax.random.normal(k_x1, (B, C, H, W), jnp.float32)
    params = _make_params(k_p1, Din, Dh, De, Dp, Dd)
    ref_e, ref_p, ref_d, ref_n = _reference(x, params)

    # f32 compute path (tolerance allows for the algebraic head fold + TPU
    # default matmul precision).
    prep_f32 = prepare_params(params, compute_dtype=jnp.float32)
    x_e, x_p, x_d = head_switch_forward(x, prep_f32, skip_head=False)
    x_n = head_switch_forward(x, prep_f32, skip_head=True)
    jax.block_until_ready((x_e, x_p, x_d, x_n))
    _check("f32 x_e", x_e, ref_e, 3e-3, 3e-2)
    _check("f32 x_p", x_p, ref_p, 3e-3, 3e-2)
    _check("f32 x_d", x_d, ref_d, 3e-3, 3e-2)
    _check("f32 norm", x_n, ref_n, 1e-4, 1e-4)

    # bf16-streamed path (f32 accumulate / epilogue) — the perf default.
    prep_bf16 = prepare_params(params, compute_dtype=jnp.bfloat16)
    x_e, x_p, x_d = head_switch_forward(x, prep_bf16, skip_head=False)
    x_n = head_switch_forward(x, prep_bf16, skip_head=True)
    jax.block_until_ready((x_e, x_p, x_d, x_n))
    _check("bf16 x_e", x_e, ref_e, 1e-2, 5e-2)
    _check("bf16 x_p", x_p, ref_p, 1e-2, 5e-2)
    _check("bf16 x_d", x_d, ref_d, 1e-2, 5e-2)
    _check("bf16 norm", x_n, ref_n, 1e-2, 5e-2)

    # ----- Test 2: exercise K-tiled accumulate + resident weight + batch tiles
    B2, C2, H2, W2 = 20, 4, 32, 32
    Din2 = C2 * H2 * W2                      # 4096
    x2 = jax.random.normal(k_x2, (B2, C2, H2, W2), jnp.float32)
    params2 = _make_params(k_p2, Din2, Dh, De, Dp, Dd)
    ref_e2, ref_p2, ref_d2, ref_n2 = _reference(x2, params2)

    prep2 = prepare_params(params2, compute_dtype=jnp.bfloat16)
    # Small tm / tk force: 3 batch tiles x 8 K tiles, weight resident in VMEM.
    y_e, y_p, y_d = head_switch_forward(x2, prep2, skip_head=False,
                                        tk_max=512, tm_max=8)
    y_n = head_switch_forward(x2, prep2, skip_head=True,
                              tk_max=512, tm_max=8)
    jax.block_until_ready((y_e, y_p, y_d, y_n))
    _check("tiled x_e", y_e, ref_e2, 2e-2, 5e-2)
    _check("tiled x_p", y_p, ref_p2, 2e-2, 5e-2)
    _check("tiled x_d", y_d, ref_d2, 2e-2, 5e-2)
    _check("tiled norm", y_n, ref_n2, 2e-2, 5e-2)

    print("KERNEL_OK")
</pallas_src>

<mosaic_0001>
module attributes {stable_mosaic.version = 11 : i64} {
  func.func @_linear_kernel(%arg0: i32, %arg1: memref<8x1024xf32, #tpu.memory_space<vmem>>, %arg2: memref<1024x128xf32, #tpu.memory_space<vmem>>, %arg3: memref<1x128xf32, #tpu.memory_space<vmem>>, %arg4: memref<8x128xf32, #tpu.memory_space<vmem>>) attributes {dimension_semantics = [#tpu.dimension_semantics<parallel>], iteration_bounds = array<i64: 1>, scalar_prefetch = 0 : i64, scratch_operands = 0 : i64, tpu.core_type = #tpu.core_type<tc>, window_params = [{transform_indices = @transform_0, window_bounds = array<i64: 8, 1024>}, {pipeline_mode = #tpu.pipeline_mode<synchronous>, transform_indices = @transform_1, window_bounds = array<i64: 1024, 128>}, {pipeline_mode = #tpu.pipeline_mode<synchronous>, transform_indices = @transform_2, window_bounds = array<i64: 1, 128>}, {transform_indices = @transform_3, window_bounds = array<i64: 8, 128>}]} {
    %c0 = arith.constant 0 : index
    %c0_0 = arith.constant 0 : index
    %0 = vector.load %arg1[%c0, %c0_0] : memref<8x1024xf32, #tpu.memory_space<vmem>>, vector<8x1024xf32>
    %c0_1 = arith.constant 0 : index
    %c0_2 = arith.constant 0 : index
    %1 = vector.load %arg2[%c0_1, %c0_2] : memref<1024x128xf32, #tpu.memory_space<vmem>>, vector<1024x128xf32>
    %cst = arith.constant dense<0.000000e+00> : vector<8x128xf32>
    %2 = tpu.matmul %0, %1, %cst {dimension_numbers = #tpu.dot_dimension_numbers<[1], [0], [0], [1], [0, 0, 1, 1], [], []>} : vector<8x1024xf32>, vector<1024x128xf32>, vector<8x128xf32> -> vector<8x128xf32>
    %c0_3 = arith.constant 0 : index
    %c0_4 = arith.constant 0 : index
    %3 = vector.load %arg3[%c0_3, %c0_4] : memref<1x128xf32, #tpu.memory_space<vmem>>, vector<1x128xf32>
    %4 = vector.broadcast %3 : vector<1x128xf32> to vector<8x128xf32>
    %5 = arith.addf %2, %4 : vector<8x128xf32>
    %c0_5 = arith.constant 0 : index
    %c0_6 = arith.constant 0 : index
    %6 = vector.load %arg4[%c0_5, %c0_6] : memref<8x128xf32, #tpu.memory_space<vmem>>, vector<8x128xf32>
    tpu.vector_store %arg4[%c0_5, %c0_6], %5 {strides = array<i32>} : memref<8x128xf32, #tpu.memory_space<vmem>>, vector<8x128xf32>,
    return
  }
  func.func @transform_0(%arg0: i32) -> (i32, i32) {
    %c0_i32 = arith.constant 0 : i32
    %c0_i32_0 = arith.constant 0 : i32
    return %arg0, %c0_i32 : i32, i32
  }
  func.func @transform_1(%arg0: i32) -> (i32, i32) {
    %c0_i32 = arith.constant 0 : i32
    %c0_i32_0 = arith.constant 0 : i32
    %c0_i32_1 = arith.constant 0 : i32
    return %c0_i32, %c0_i32_0 : i32, i32
  }
  func.func @transform_2(%arg0: i32) -> (i32, i32) {
    %c0_i32 = arith.constant 0 : i32
    %c0_i32_0 = arith.constant 0 : i32
    %c0_i32_1 = arith.constant 0 : i32
    return %c0_i32, %c0_i32_0 : i32, i32
  }
  func.func @transform_3(%arg0: i32) -> (i32, i32) {
    %c0_i32 = arith.constant 0 : i32
    %c0_i32_0 = arith.constant 0 : i32
    return %arg0, %c0_i32 : i32, i32
  }
}

</mosaic_0001>

<bundles_post_ra>
// kernel: tpu_custom_call.1
= control target key start
LH: loop header
LB: loop body
LE: loop exit
PB: predicated region body
PF: predicated region fallthrough
CT: control target
= control target key end

     0   :  { %8 = vsyncpa [#allocation3], 0  ;;  %s730_s0 = inlined_call_operand.hbm [shape: f32[8,1024], index: 0, kind: input, shape index: {}]   ;;  %s731_s1 = inlined_call_operand.hbm [shape: f32[1024,128], index: 1, kind: input, shape index: {}]   ;;  %s732_s2 = inlined_call_operand.vmem [shape: f32[1,128], index: 2, kind: input, shape index: {}]   ;;  %s733_s3 = inlined_call_operand.hbm [shape: f32[8,128], index: 3, kind: output, shape index: {}]  }
   0x1   :  { %9 = vsyncpa [#allocation6], 0 }
   0x2   :  { %10 = vsyncpa [#allocation4], 0  ;;  %s693_s12 = smov [#allocation2]   ;;  %s694_s14 = smov [#allocation5]  }
   0x3   :  { %s17_s13 = sshll.u32 %s693_s12, 4  ;;  %s26_s15 = sshll.u32 %s694_s14, 4  ;;  %s18_s13 = int_to_ptr.vmem [resolvable:$true] %s17_s13  ;;  %s27_s15 = int_to_ptr.vmem [resolvable:$true] %s26_s15 }
   0x4   :  { %s635_s16 = scalar_lea.vmem %s18_s13, 1024  ;;  %p640_p1 = scmp.lt.s32.totalorder %s18_s13, %s18_s13 }
   0x5   :  { %p636_p0 = scmp.ne.s32.totalorder %s18_s13, %s635_s16  ;;  %p641_p2 = scmp.lt.s32.totalorder %s635_s16, %s635_s16 }
   0x7   :  { %p642_p3 = por %p641_p2, %p640_p1 }
   0x9   :  { %p643_p4 = pnand %p642_p3, %p636_p0 }
   0xb   :  { %646 = shalt.err (!%p643_p4)
}
   0xc   :  { %20 = dma.hbm_to_vmem [thread:$0]  %s730_s0, 1024, %s18_s13, [#allocation3]  }
   0xd   :  { %s655_s19 = scalar_lea.vmem %s27_s15, 16384  ;;  %p660_p6 = scmp.lt.s32.totalorder %s27_s15, %s27_s15 }
   0xe   :  { %p656_p5 = scmp.ne.s32.totalorder %s27_s15, %s655_s19  ;;  %p661_p7 = scmp.lt.s32.totalorder %s655_s19, %s655_s19 }
  0x10   :  { %p662_p8 = por %p661_p7, %p660_p6 }
  0x12   :  { %p663_p9 = pnand %p662_p8, %p656_p5 }
  0x14   :  { %666 = shalt.err (!%p663_p9)
}
  0x15   :  { %s695_s20 = smov 128   ;;  %s696_s21 = smov 8  }
  0x16   :  { %32 = dma.hbm_to_vmem [thread:$0]  %s731_s1, 16384, %s27_s15, [#allocation6], %s695_s20, %s695_s20, %s696_s21  }
  0x17   :  { %687 = dma.done.wait [#allocation3], 1024  }
  0x18   :  { %688 = vsyncadd [#allocation3], 4294966272 }
  0x19   :  { %689 = dma.done.wait [#allocation6], 16384  }
  0x1a   :  { %690 = vsyncadd [#allocation6], 4294950912  ;;  %v80_v0 = vld [vmem:[#allocation5 + $0xf8] sm:$0xff]  ;;  %v79_v4 = vld [vmem:[#allocation5 + $0xf0] sm:$0xff]  ;;  %s697_s24 = smov [#allocation7]  }
  0x1b   :  { %v112_v1 = vld [vmem:[#allocation5 + $0x1f8] sm:$0xff]  ;;  %482 = vmatprep.subr.mxu0 %v80_v0  ;;  %v111_v5 = vld [vmem:[#allocation5 + $0x1f0] sm:$0xff]  ;;  %v78_v8 = vld [vmem:[#allocation5 + $0xe8] sm:$0xff]  ;;  %s471_s25 = sshll.u32 %s697_s24, 4  ;;  %s472_s25 = int_to_ptr.vmem [resolvable:$true] %s471_s25 }
  0x1c   :  { %v64_v2 = vld [vmem:[#allocation5 + $0x78] sm:$0xff]  ;;  %517 = vmatprep.subr.mxu1 %v112_v1  ;;  %v63_v6 = vld [vmem:[#allocation5 + $0x70] sm:$0xff]  ;;  %v110_v9 = vld [vmem:[#allocation5 + $0x1e8] sm:$0xff]  ;;  %s667_s26 = scalar_lea.vmem %s472_s25, 128  ;;  %p672_p11 = scmp.lt.s32.totalorder %s472_s25, %s472_s25 }
  0x1d   :  { %v96_v3 = vld [vmem:[#allocation5 + $0x178] sm:$0xff]  ;;  %483 = vmatpush3.msra.mxu0 %v64_v2  ;;  %v95_v7 = vld [vmem:[#allocation5 + $0x170] sm:$0xff]  ;;  %v62_v10 = vld [vmem:[#allocation5 + $0x68] sm:$0xff]  ;;  %p668_p10 = scmp.ne.s32.totalorder %s472_s25, %s667_s26  ;;  %p673_p12 = scmp.lt.s32.totalorder %s667_s26, %s667_s26 }
  0x1e   :  { %518 = vmatpush3.msra.mxu1 %v96_v3  ;;  %484 = vmatprep.subr.mxu0 %v79_v4  ;;  %v94_v11 = vld [vmem:[#allocation5 + $0x168] sm:$0xff]  ;;  %v77_v12 = vld [vmem:[#allocation5 + $0xe0] sm:$0xff]  ;;  %v76_v16 = vld [vmem:[#allocation5 + $0xd8] sm:$0xff] }
  0x1f   :  { %519 = vmatprep.subr.mxu1 %v111_v5  ;;  %485 = vmatpush3.msra.mxu0 %v63_v6  ;;  %v109_v13 = vld [vmem:[#allocation5 + $0x1e0] sm:$0xff]  ;;  %v108_v17 = vld [vmem:[#allocation5 + $0x1d8] sm:$0xff]  ;;  %v75_v20 = vld [vmem:[#allocation5 + $0xd0] sm:$0xff]  ;;  %p674_p13 = por %p673_p12, %p672_p11 }
  0x20   :  { %520 = vmatpush3.msra.mxu1 %v95_v7  ;;  %486 = vmatprep.subr.mxu0 %v78_v8  ;;  %v61_v14 = vld [vmem:[#allocation5 + $0x60] sm:$0xff]  ;;  %v60_v18 = vld [vmem:[#allocation5 + $0x58] sm:$0xff]  ;;  %v107_v21 = vld [vmem:[#allocation5 + $0x1d0] sm:$0xff] }
  0x21   :  { %521 = vmatprep.subr.mxu1 %v110_v9  ;;  %v93_v15 = vld [vmem:[#allocation5 + $0x160] sm:$0xff]  ;;  %487 = vmatpush3.msra.mxu0 %v62_v10  ;;  %v92_v19 = vld [vmem:[#allocation5 + $0x158] sm:$0xff]  ;;  %v59_v22 = vld [vmem:[#allocation5 + $0x50] sm:$0xff]  ;;  %p675_p0 = pnand %p674_p13, %p668_p10 }
  0x22   :  { %522 = vmatpush3.msra.mxu1 %v94_v11  ;;  %488 = vmatprep.subr.mxu0 %v77_v12  ;;  %v91_v23 = vld [vmem:[#allocation5 + $0x150] sm:$0xff]  ;;  %v74_v24 = vld [vmem:[#allocation5 + $0xc8] sm:$0xff]  ;;  %v73_v28 = vld [vmem:[#allocation5 + $0xc0] sm:$0xff] }
  0x23   :  { %523 = vmatprep.subr.mxu1 %v109_v13  ;;  %489 = vmatpush3.msra.mxu0 %v61_v14  ;;  %v106_v25 = vld [vmem:[#allocation5 + $0x1c8] sm:$0xff]  ;;  %v105_v29 = vld [vmem:[#allocation5 + $0x1c0] sm:$0xff]  ;;  %v72_v32 = vld [vmem:[#allocation5 + $0xb8] sm:$0xff] }
  0x24   :  { %524 = vmatpush3.msra.mxu1 %v93_v15  ;;  %490 = vmatprep.subr.mxu0 %v76_v16  ;;  %v58_v26 = vld [vmem:[#allocation5 + $0x48] sm:$0xff]  ;;  %v57_v30 = vld [vmem:[#allocation5 + $0x40] sm:$0xff]  ;;  %v104_v33 = vld [vmem:[#allocation5 + $0x1b8] sm:$0xff] }
  0x25   :  { %525 = vmatprep.subr.mxu1 %v108_v17  ;;  %491 = vmatpush3.msra.mxu0 %v60_v18  ;;  %v90_v27 = vld [vmem:[#allocation5 + $0x148] sm:$0xff]  ;;  %v89_v31 = vld [vmem:[#allocation5 + $0x140] sm:$0xff]  ;;  %v56_v34 = vld [vmem:[#allocation5 + $0x38] sm:$0xff] }
  0x26   :  { %526 = vmatpush3.msra.mxu1 %v92_v19  ;;  %492 = vmatprep.subr.mxu0 %v75_v20  ;;  %v88_v35 = vld [vmem:[#allocation5 + $0x138] sm:$0xff]  ;;  %v71_v36 = vld [vmem:[#allocation5 + $0xb0] sm:$0xff]  ;;  %v70_v40 = vld [vmem:[#allocation5 + $0xa8] sm:$0xff] }
  0x27   :  { %527 = vmatprep.subr.mxu1 %v107_v21  ;;  %493 = vmatpush3.msra.mxu0 %v59_v22  ;;  %v103_v37 = vld [vmem:[#allocation5 + $0x1b0] sm:$0xff]  ;;  %v102_v41 = vld [vmem:[#allocation5 + $0x1a8] sm:$0xff]  ;;  %v69_v44 = vld [vmem:[#allocation5 + $0xa0] sm:$0xff] }
  0x28   :  { %528 = vmatpush3.msra.mxu1 %v91_v23  ;;  %494 = vmatprep.subr.mxu0 %v74_v24  ;;  %v55_v38 = vld [vmem:[#allocation5 + $0x30] sm:$0xff]  ;;  %v54_v42 = vld [vmem:[#allocation5 + $0x28] sm:$0xff]  ;;  %v101_v45 = vld [vmem:[#allocation5 + $0x1a0] sm:$0xff] }
  0x29   :  { %529 = vmatprep.subr.mxu1 %v106_v25  ;;  %495 = vmatpush3.msra.mxu0 %v58_v26  ;;  %v87_v39 = vld [vmem:[#allocation5 + $0x130] sm:$0xff]  ;;  %v86_v43 = vld [vmem:[#allocation5 + $0x128] sm:$0xff]  ;;  %v53_v46 = vld [vmem:[#allocation5 + $0x20] sm:$0xff] }
  0x2a   :  { %530 = vmatpush3.msra.mxu1 %v90_v27  ;;  %496 = vmatprep.subr.mxu0 %v73_v28  ;;  %v85_v47 = vld [vmem:[#allocation5 + $0x120] sm:$0xff]  ;;  %v68_v48 = vld [vmem:[#allocation5 + $0x98] sm:$0xff]  ;;  %v67_v52 = vld [vmem:[#allocation5 + $0x90] sm:$0xff] }
  0x2b   :  { %531 = vmatprep.subr.mxu1 %v105_v29  ;;  %497 = vmatpush3.msra.mxu0 %v57_v30  ;;  %v100_v49 = vld [vmem:[#allocation5 + $0x198] sm:$0xff]  ;;  %v99_v53 = vld [vmem:[#allocation5 + $0x190] sm:$0xff]  ;;  %v66_v56 = vld [vmem:[#allocation5 + $0x88] sm:$0xff] }
  0x2c   :  { %532 = vmatpush3.msra.mxu1 %v89_v31  ;;  %498 = vmatprep.subr.mxu0 %v72_v32  ;;  %v52_v50 = vld [vmem:[#allocation5 + $0x18] sm:$0xff]  ;;  %v51_v54 = vld [vmem:[#allocation5 + $0x10] sm:$0xff]  ;;  %v98_v57 = vld [vmem:[#allocation5 + $0x188] sm:$0xff] }
  0x2d   :  { %533 = vmatprep.subr.mxu1 %v104_v33  ;;  %499 = vmatpush3.msra.mxu0 %v56_v34  ;;  %v84_v51 = vld [vmem:[#allocation5 + $0x118] sm:$0xff]  ;;  %v83_v55 = vld [vmem:[#allocation5 + $0x110] sm:$0xff]  ;;  %v50_v58 = vld [vmem:[#allocation5 + $0x8] sm:$0xff] }
  0x2e   :  { %534 = vmatpush3.msra.mxu1 %v88_v35  ;;  %500 = vmatprep.subr.mxu0 %v71_v36  ;;  %v82_v59 = vld [vmem:[#allocation5 + $0x108] sm:$0xff]  ;;  %v65_v60 = vld [vmem:[#allocation5 + $0x80] sm:$0xff]  ;;  %v44_v2 = vld [vmem:[#allocation2 + $0x18] sm:$0xff] }
  0x2f   :  { %535 = vmatprep.subr.mxu1 %v103_v37  ;;  %501 = vmatpush3.msra.mxu0 %v55_v38  ;;  %v97_v61 = vld [vmem:[#allocation5 + $0x180] sm:$0xff]  ;;  %v42_v63 = vld [vmem:[#allocation2 + $0x8] sm:$0xff]  ;;  %v144_v3 = vld [vmem:[#allocation5 + $0x2f8] sm:$0xff] }
  0x30   :  { %536 = vmatpush3.msra.mxu1 %v87_v39  ;;  %502 = vmatprep.subr.mxu0 %v70_v40  ;;  %v49_v62 = vld [vmem:[#allocation5] sm:$0xff]  ;;  %v176_v4 = vld [vmem:[#allocation5 + $0x3f8] sm:$0xff]  ;;  %v43_v5 = vld [vmem:[#allocation2 + $0x10] sm:$0xff] }
  0x31   :  { %537 = vmatprep.subr.mxu1 %v102_v41  ;;  %503 = vmatpush3.msra.mxu0 %v54_v42  ;;  %v81_v0 = vld [vmem:[#allocation5 + $0x100] sm:$0xff]  ;;  %v128_v6 = vld [vmem:[#allocation5 + $0x278] sm:$0xff]  ;;  %v143_v8 = vld [vmem:[#allocation5 + $0x2f0] sm:$0xff] }
  0x32   :  { %538 = vmatpush3.msra.mxu1 %v86_v43  ;;  %504 = vmatprep.subr.mxu0 %v69_v44  ;;  %v41_v1 = vld [vmem:[#allocation2] sm:$0xff]  ;;  %v160_v7 = vld [vmem:[#allocation5 + $0x378] sm:$0xff]  ;;  %v175_v9 = vld [vmem:[#allocation5 + $0x3f0] sm:$0xff] }
  0x33   :  { %539 = vmatprep.subr.mxu1 %v101_v45  ;;  %505 = vmatpush3.msra.mxu0 %v53_v46  ;;  %v127_v10 = vld [vmem:[#allocation5 + $0x270] sm:$0xff]  ;;  %v142_v12 = vld [vmem:[#allocation5 + $0x2e8] sm:$0xff]  ;;  %v141_v16 = vld [vmem:[#allocation5 + $0x2e0] sm:$0xff] }
  0x34   :  { %540 = vmatpush3.msra.mxu1 %v85_v47  ;;  %506 = vmatprep.subr.mxu0 %v68_v48  ;;  %v159_v11 = vld [vmem:[#allocation5 + $0x370] sm:$0xff]  ;;  %v174_v13 = vld [vmem:[#allocation5 + $0x3e8] sm:$0xff]  ;;  %v173_v17 = vld [vmem:[#allocation5 + $0x3e0] sm:$0xff] }
  0x35   :  { %541 = vmatprep.subr.mxu1 %v100_v49  ;;  %507 = vmatpush3.msra.mxu0 %v52_v50  ;;  %v126_v14 = vld [vmem:[#allocation5 + $0x268] sm:$0xff]  ;;  %v125_v18 = vld [vmem:[#allocation5 + $0x260] sm:$0xff]  ;;  %v140_v20 = vld [vmem:[#allocation5 + $0x2d8] sm:$0xff] }
  0x36   :  { %542 = vmatpush3.msra.mxu1 %v84_v51  ;;  %508 = vmatprep.subr.mxu0 %v67_v52  ;;  %v158_v15 = vld [vmem:[#allocation5 + $0x368] sm:$0xff]  ;;  %v157_v19 = vld [vmem:[#allocation5 + $0x360] sm:$0xff]  ;;  %v172_v21 = vld [vmem:[#allocation5 + $0x3d8] sm:$0xff] }
  0x37   :  { %543 = vmatprep.subr.mxu1 %v99_v53  ;;  %509 = vmatpush3.msra.mxu0 %v51_v54  ;;  %v124_v22 = vld [vmem:[#allocation5 + $0x258] sm:$0xff]  ;;  %v139_v24 = vld [vmem:[#allocation5 + $0x2d0] sm:$0xff]  ;;  %v138_v28 = vld [vmem:[#allocation5 + $0x2c8] sm:$0xff] }
  0x38   :  { %544 = vmatpush3.msra.mxu1 %v83_v55  ;;  %510 = vmatprep.subr.mxu0 %v66_v56  ;;  %v156_v23 = vld [vmem:[#allocation5 + $0x358] sm:$0xff]  ;;  %v171_v25 = vld [vmem:[#allocation5 + $0x3d0] sm:$0xff]  ;;  %v170_v29 = vld [vmem:[#allocation5 + $0x3c8] sm:$0xff] }
  0x39   :  { %545 = vmatprep.subr.mxu1 %v98_v57  ;;  %511 = vmatpush3.msra.mxu0 %v50_v58  ;;  %v123_v26 = vld [vmem:[#allocation5 + $0x250] sm:$0xff]  ;;  %v122_v30 = vld [vmem:[#allocation5 + $0x248] sm:$0xff]  ;;  %v137_v32 = vld [vmem:[#allocation5 + $0x2c0] sm:$0xff] }
  0x3a   :  { %546 = vmatpush3.msra.mxu1 %v82_v59  ;;  %512 = vmatprep.subr.mxu0 %v65_v60  ;;  %v155_v27 = vld [vmem:[#allocation5 + $0x350] sm:$0xff]  ;;  %v154_v31 = vld [vmem:[#allocation5 + $0x348] sm:$0xff]  ;;  %v169_v33 = vld [vmem:[#allocation5 + $0x3c0] sm:$0xff] }
  0x3b   :  { %547 = vmatprep.subr.mxu1 %v97_v61  ;;  %513 = vmatpush3.msra.mxu0 %v49_v62  ;;  %v121_v34 = vld [vmem:[#allocation5 + $0x240] sm:$0xff]  ;;  %v136_v36 = vld [vmem:[#allocation5 + $0x2b8] sm:$0xff]  ;;  %v135_v40 = vld [vmem:[#allocation5 + $0x2b0] sm:$0xff] }
  0x3c   :  { %248 = vmatprep.mubr.f32.mxu0 %v42_v63  ;;  %548 = vmatpush3.msra.mxu1 %v81_v0  ;;  %v153_v35 = vld [vmem:[#allocation5 + $0x340] sm:$0xff]  ;;  %v168_v37 = vld [vmem:[#allocation5 + $0x3b8] sm:$0xff]  ;;  %v167_v41 = vld [vmem:[#allocation5 + $0x3b0] sm:$0xff] }
  0x3d   :  { %249 = vmatmul.mubr.f32.vlgmr.msra.gmra.mxu0 %v41_v1  ;;  %318 = vmatprep.mubr.f32.mxu1 %v44_v2  ;;  %v120_v38 = vld [vmem:[#allocation5 + $0x238] sm:$0xff]  ;;  %v119_v42 = vld [vmem:[#allocation5 + $0x230] sm:$0xff]  ;;  %v134_v44 = vld [vmem:[#allocation5 + $0x2a8] sm:$0xff] }
  0x3e   :  { %552 = vmatprep.subr.mxu0 %v144_v3  ;;  %587 = vmatprep.subr.mxu1 %v176_v4  ;;  %v152_v39 = vld [vmem:[#allocation5 + $0x338] sm:$0xff]  ;;  %v151_v43 = vld [vmem:[#allocation5 + $0x330] sm:$0xff]  ;;  %v166_v45 = vld [vmem:[#allocation5 + $0x3a8] sm:$0xff] }
  0x3f   :  { %319 = vmatmul.mubr.f32.vlgmr.msra.gmra.mxu1 %v43_v5  ;;  %553 = vmatpush3.msra.mxu0 %v128_v6  ;;  %v118_v46 = vld [vmem:[#allocation5 + $0x228] sm:$0xff]  ;;  %v133_v48 = vld [vmem:[#allocation5 + $0x2a0] sm:$0xff]  ;;  %v132_v52 = vld [vmem:[#allocation5 + $0x298] sm:$0xff] }
  0x40   :  { %588 = vmatpush3.msra.mxu1 %v160_v7  ;;  %554 = vmatprep.subr.mxu0 %v143_v8  ;;  %v150_v47 = vld [vmem:[#allocation5 + $0x328] sm:$0xff]  ;;  %v165_v49 = vld [vmem:[#allocation5 + $0x3a0] sm:$0xff]  ;;  %v164_v53 = vld [vmem:[#allocation5 + $0x398] sm:$0xff] }
  0x41   :  { %589 = vmatprep.subr.mxu1 %v175_v9  ;;  %555 = vmatpush3.msra.mxu0 %v127_v10  ;;  %v117_v50 = vld [vmem:[#allocation5 + $0x220] sm:$0xff]  ;;  %v116_v54 = vld [vmem:[#allocation5 + $0x218] sm:$0xff]  ;;  %v131_v56 = vld [vmem:[#allocation5 + $0x290] sm:$0xff] }
  0x42   :  { %590 = vmatpush3.msra.mxu1 %v159_v11  ;;  %556 = vmatprep.subr.mxu0 %v142_v12  ;;  %v149_v51 = vld [vmem:[#allocation5 + $0x320] sm:$0xff]  ;;  %v148_v55 = vld [vmem:[#allocation5 + $0x318] sm:$0xff]  ;;  %v163_v57 = vld [vmem:[#allocation5 + $0x390] sm:$0xff] }
  0x43   :  { %591 = vmatprep.subr.mxu1 %v174_v13  ;;  %557 = vmatpush3.msra.mxu0 %v126_v14  ;;  %v115_v58 = vld [vmem:[#allocation5 + $0x210] sm:$0xff]  ;;  %v130_v60 = vld [vmem:[#allocation5 + $0x288] sm:$0xff]  ;;  %v129_v0 = vld [vmem:[#allocation5 + $0x280] sm:$0xff] }
  0x44   :  { %592 = vmatpush3.msra.mxu1 %v158_v15  ;;  %558 = vmatprep.subr.mxu0 %v141_v16  ;;  %v147_v59 = vld [vmem:[#allocation5 + $0x310] sm:$0xff]  ;;  %v162_v61 = vld [vmem:[#allocation5 + $0x388] sm:$0xff]  ;;  %v161_v1 = vld [vmem:[#allocation5 + $0x380] sm:$0xff] }
  0x45   :  { %593 = vmatprep.subr.mxu1 %v173_v17  ;;  %559 = vmatpush3.msra.mxu0 %v125_v18  ;;  %v114_v62 = vld [vmem:[#allocation5 + $0x208] sm:$0xff]  ;;  %v113_v2 = vld [vmem:[#allocation5 + $0x200] sm:$0xff]  ;;  %v48_v5 = vld [vmem:[#allocation2 + $0x38] sm:$0xff] }
  0x46   :  { %594 = vmatpush3.msra.mxu1 %v157_v19  ;;  %560 = vmatprep.subr.mxu0 %v140_v20  ;;  %v146_v63 = vld [vmem:[#allocation5 + $0x308] sm:$0xff]  ;;  %v145_v4 = vld [vmem:[#allocation5 + $0x300] sm:$0xff]  ;;  %v47_v7 = vld [vmem:[#allocation2 + $0x30] sm:$0xff] }
  0x47   :  { %595 = vmatprep.subr.mxu1 %v172_v21  ;;  %561 = vmatpush3.msra.mxu0 %v124_v22  ;;  %v46_v3 = vld [vmem:[#allocation2 + $0x28] sm:$0xff]  ;;  %v45_v6 = vld [vmem:[#allocation2 + $0x20] sm:$0xff] }
  0x48   :  { %596 = vmatpush3.msra.mxu1 %v156_v23  ;;  %562 = vmatprep.subr.mxu0 %v139_v24  ;;  %v481_v12 = vld [vmem:[%s732_s2] ss:$0 sm:$0xff] }
  0x49   :  { %597 = vmatprep.subr.mxu1 %v171_v25  ;;  %563 = vmatpush3.msra.mxu0 %v123_v26 }
  0x4a   :  { %598 = vmatpush3.msra.mxu1 %v155_v27  ;;  %564 = vmatprep.subr.mxu0 %v138_v28 }
  0x4b   :  { %599 = vmatprep.subr.mxu1 %v170_v29  ;;  %565 = vmatpush3.msra.mxu0 %v122_v30 }
  0x4c   :  { %600 = vmatpush3.msra.mxu1 %v154_v31  ;;  %566 = vmatprep.subr.mxu0 %v137_v32 }
  0x4d   :  { %601 = vmatprep.subr.mxu1 %v169_v33  ;;  %567 = vmatpush3.msra.mxu0 %v121_v34 }
  0x4e   :  { %602 = vmatpush3.msra.mxu1 %v153_v35  ;;  %568 = vmatprep.subr.mxu0 %v136_v36 }
  0x4f   :  { %603 = vmatprep.subr.mxu1 %v168_v37  ;;  %569 = vmatpush3.msra.mxu0 %v120_v38 }
  0x50   :  { %604 = vmatpush3.msra.mxu1 %v152_v39  ;;  %570 = vmatprep.subr.mxu0 %v135_v40 }
  0x51   :  { %605 = vmatprep.subr.mxu1 %v167_v41  ;;  %571 = vmatpush3.msra.mxu0 %v119_v42 }
  0x52   :  { %606 = vmatpush3.msra.mxu1 %v151_v43  ;;  %572 = vmatprep.subr.mxu0 %v134_v44 }
  0x53   :  { %607 = vmatprep.subr.mxu1 %v166_v45  ;;  %573 = vmatpush3.msra.mxu0 %v118_v46 }
  0x54   :  { %608 = vmatpush3.msra.mxu1 %v150_v47  ;;  %574 = vmatprep.subr.mxu0 %v133_v48 }
  0x55   :  { %609 = vmatprep.subr.mxu1 %v165_v49  ;;  %575 = vmatpush3.msra.mxu0 %v117_v50 }
  0x56   :  { %610 = vmatpush3.msra.mxu1 %v149_v51  ;;  %576 = vmatprep.subr.mxu0 %v132_v52 }
  0x57   :  { %611 = vmatprep.subr.mxu1 %v164_v53  ;;  %577 = vmatpush3.msra.mxu0 %v116_v54 }
  0x58   :  { %612 = vmatpush3.msra.mxu1 %v148_v55  ;;  %578 = vmatprep.subr.mxu0 %v131_v56 }
  0x59   :  { %613 = vmatprep.subr.mxu1 %v163_v57  ;;  %579 = vmatpush3.msra.mxu0 %v115_v58 }
  0x5a   :  { %614 = vmatpush3.msra.mxu1 %v147_v59  ;;  %580 = vmatprep.subr.mxu0 %v130_v60 }
  0x5b   :  { %615 = vmatprep.subr.mxu1 %v162_v61  ;;  %581 = vmatpush3.msra.mxu0 %v114_v62 }
  0x5c   :  { %616 = vmatpush3.msra.mxu1 %v146_v63  ;;  %582 = vmatprep.subr.mxu0 %v129_v0 }
  0x5d   :  { %617 = vmatprep.subr.mxu1 %v161_v1  ;;  %583 = vmatpush3.msra.mxu0 %v113_v2 }
  0x5e   :  { %388 = vmatprep.mubr.f32.mxu0 %v46_v3  ;;  %618 = vmatpush3.msra.mxu1 %v145_v4 }
  0x5f   :  { %458 = vmatprep.mubr.f32.mxu1 %v48_v5  ;;  %389 = vmatmul.mubr.f32.vlgmr.msra.gmra.mxu0 %v45_v6 }
  0x60   :  { %459 = vmatmul.mubr.f32.vlgmr.msra.gmra.mxu1 %v47_v7 }
  0xfd   :  { %v514_v8 = vpop.f32.mrf.mxu0 }
  0xff   :  { %v549_v9 = vpop.f32.mrf.mxu1  ;;  %v515_v10 = vpop.f32.mrf.mxu0 }
 0x100   :  { %v516_v11 = vadd.f32 %v515_v10, %v514_v8 }
 0x101   :  { %v550_v13 = vpop.f32.mrf.mxu1 }
 0x102   :  { %v251_v14 = vadd.f32 %v516_v11, %v481_v12  ;;  %v551_v15 = vadd.f32 %v550_v13, %v549_v9 }
 0x104   :  { %v321_v20 = vadd.f32 %v551_v15, %v251_v14 }
 0x11f   :  { %v584_v16 = vpop.f32.mrf.mxu0 }
 0x120   :  { %v619_v17 = vpop.f32.mrf.mxu1 }
 0x121   :  { %v585_v18 = vpop.f32.mrf.mxu0 }
 0x122   :  { %v620_v19 = vpop.f32.mrf.mxu1  ;;  %v586_v21 = vadd.f32 %v585_v18, %v584_v16 }
 0x123   :  { %v621_v23 = vadd.f32 %v620_v19, %v619_v17 }
 0x124   :  { %v391_v22 = vadd.f32 %v586_v21, %v321_v20 }
 0x126   :  { %v461_v24 = vadd.f32 %v621_v23, %v391_v22 }
 0x128   :  { %464 = vst [vmem:[#allocation7] sm:$0xff] %v461_v24 }
 0x129   :  { %678 = shalt.err (!%p675_p0)
}
 0x12a   :  { %474 = dma.vmem_to_hbm [thread:$0]  %s472_s25, 128, %s733_s3, [#allocation4]  }
 0x12b   :  { %691 = dma.done.wait [#allocation4], 128  }
 0x12c   :  { %692 = vsyncadd [#allocation4], 4294967168 }
 0x12d   :  { %478 = vsyncpa [#allocation3], 1 }
 0x12e   :  { %479 = vsyncpa [#allocation6], 1 }
 0x12f   :  { %480 = vsyncpa [#allocation4], 1 }

</bundles_post_ra>
